<compile_context>
chip_gen: v5e
topology: v5e:2x2
jax: 0.10.0
libtpu: 0.0.40
codegen_flags: <defaults>
</compile_context>

<pallas_src>
import jax
import jax.numpy as jnp
from jax.experimental import pallas as pl
from jax.experimental.pallas import tpu as pltpu


def _round_up(v, m):
    return (v + m - 1) // m * m


def _linear_kernel(x_ref, w_ref, b_ref, o_ref, acc_ref):
    # x_ref: (tm, tk)  w_ref: (tk, tn)  b_ref: (1, tn)  o_ref: (tm, tn)
    # acc_ref: (tm, tn) f32 scratch, resident across the K grid axis.
    k = pl.program_id(2)

    @pl.when(k == 0)
    def _():
        acc_ref[...] = jnp.zeros_like(acc_ref)

    acc_ref[...] += jnp.dot(x_ref[...], w_ref[...],
                            preferred_element_type=jnp.float32)

    # Bias epilogue: add once, on the last K step only.
    @pl.when(k == pl.num_programs(2) - 1)
    def _():
        o_ref[...] = (acc_ref[...] + b_ref[...]).astype(o_ref.dtype)


def base_model_forward(x_nchw, weight, bias, *, tm=128, tn=128, tk=512):
    """Flatten + Linear head of BaseModel.

    x_nchw: (N, C, H, W) float32
    weight: (C*H*W, categories) float32   (PyTorch linear weight, transposed)
    bias:   (categories,) float32
    returns logits: (N, categories) float32
    """
    n = x_nchw.shape[0]
    k = weight.shape[0]
    cat = weight.shape[1]

    x_flat = x_nchw.reshape(n, k)

    # --- pad to TPU-friendly, lane/sublane-dense tile multiples -------------
    # M: at least 8 sublanes (f32); tile tm caps at the padded extent.
    tm = min(tm, _round_up(n, 8))
    m_pad = _round_up(n, tm)
    # CAT: lane-dense -> multiple of 128.
    tn = min(tn, _round_up(cat, 128))
    cat_pad = _round_up(cat, tn)
    # K: bounded reduction tile (zero padding contributes nothing to the dot).
    tk = min(tk, _round_up(k, 128))
    k_pad = _round_up(k, tk)

    x_p = jnp.zeros((m_pad, k_pad), x_flat.dtype).at[:n, :k].set(x_flat)
    w_p = jnp.zeros((k_pad, cat_pad), weight.dtype).at[:k, :cat].set(weight)
    b_p = jnp.zeros((1, cat_pad), bias.dtype).at[0, :cat].set(bias)

    grid = (m_pad // tm, cat_pad // tn, k_pad // tk)

    out_padded = pl.pallas_call(
        _linear_kernel,
        out_shape=jax.ShapeDtypeStruct((m_pad, cat_pad), jnp.float32),
        grid=grid,
        in_specs=[
            pl.BlockSpec((tm, tk), lambda i, j, kk: (i, kk)),
            pl.BlockSpec((tk, tn), lambda i, j, kk: (kk, j)),
            pl.BlockSpec((1, tn), lambda i, j, kk: (0, j)),
        ],
        out_specs=pl.BlockSpec((tm, tn), lambda i, j, kk: (i, j)),
        scratch_shapes=[pltpu.VMEM((tm, tn), jnp.float32)],
        compiler_params=pltpu.CompilerParams(
            # M, CAT independent (shardable across v7x's 2 TCs); K is the
            # reduction axis and must stay last / arbitrary.
            dimension_semantics=("parallel", "parallel", "arbitrary"),
            # Double-buffered tiles (tm*tk + tk*tn + tm*tn f32) stay well under
            # this on all generations, including v7x's 64 MiB physical VMEM.
            vmem_limit_bytes=32 * 1024 * 1024,
        ),
    )(x_p, w_p, b_p)

    return out_padded[:n, :cat]


if __name__ == "__main__":
    # Small shapes consistent with the module: H=W=16, C=4, categories=10, batch=2.
    N, C, H, W = 2, 4, 16, 16
    CATEGORIES = 10
    K = C * H * W

    key = jax.random.PRNGKey(0)
    kx, kw, kb = jax.random.split(key, 3)

    x = jax.random.normal(kx, (N, C, H, W), dtype=jnp.float32)
    # Deterministic "Linear" parameters (PyTorch-style fan-in scaling).
    weight = jax.random.uniform(kw, (K, CATEGORIES), dtype=jnp.float32,
                                minval=-1.0, maxval=1.0) / jnp.sqrt(K)
    bias = jax.random.uniform(kb, (CATEGORIES,), dtype=jnp.float32,
                              minval=-1.0, maxval=1.0) / jnp.sqrt(K)

    out = base_model_forward(x, weight, bias)
    out = jax.block_until_ready(out)

    # Sanity-check against plain-JAX reference.
    ref = x.reshape(N, K) @ weight + bias
    assert out.shape == (N, CATEGORIES)
    assert jnp.allclose(out, ref, atol=1e-4, rtol=1e-4)

    print("KERNEL_OK")
</pallas_src>

<mosaic_0001>
module attributes {stable_mosaic.version = 11 : i64} {
  func.func @_linear_kernel(%arg0: i32, %arg1: i32, %arg2: i32, %arg3: memref<8x512xf32, #tpu.memory_space<vmem>>, %arg4: memref<512x128xf32, #tpu.memory_space<vmem>>, %arg5: memref<1x128xf32, #tpu.memory_space<vmem>>, %arg6: memref<8x128xf32, #tpu.memory_space<vmem>>, %arg7: memref<8x128xf32, #tpu.memory_space<vmem>>) attributes {dimension_semantics = [#tpu.dimension_semantics<parallel>, #tpu.dimension_semantics<parallel>, #tpu.dimension_semantics<arbitrary>], iteration_bounds = array<i64: 1, 1, 2>, scalar_prefetch = 0 : i64, scratch_operands = 1 : i64, tpu.core_type = #tpu.core_type<tc>, window_params = [{transform_indices = @transform_0, window_bounds = array<i64: 8, 512>}, {transform_indices = @transform_1, window_bounds = array<i64: 512, 128>}, {transform_indices = @transform_2, window_bounds = array<i64: 1, 128>}, {transform_indices = @transform_3, window_bounds = array<i64: 8, 128>}]} {
    %c0_i32 = arith.constant 0 : i32
    %0 = arith.cmpi eq, %arg2, %c0_i32 : i32
    %1 = arith.extui %0 : i1 to i32
    %c0_i32_0 = arith.constant 0 : i32
    %2 = arith.cmpi ne, %1, %c0_i32_0 : i32
    scf.if %2 {
      %cst_9 = arith.constant 0.000000e+00 : f32
      %12 = vector.broadcast %cst_9 : f32 to vector<8x128xf32>
      %c0_10 = arith.constant 0 : index
      %c0_11 = arith.constant 0 : index
      %13 = vector.load %arg7[%c0_10, %c0_11] : memref<8x128xf32, #tpu.memory_space<vmem>>, vector<8x128xf32>
      tpu.vector_store %arg7[%c0_10, %c0_11], %12 {strides = array<i32>} : memref<8x128xf32, #tpu.memory_space<vmem>>, vector<8x128xf32>,
    } else {
    }
    %c0 = arith.constant 0 : index
    %c0_1 = arith.constant 0 : index
    %3 = vector.load %arg7[%c0, %c0_1] : memref<8x128xf32, #tpu.memory_space<vmem>>, vector<8x128xf32>
    %c0_2 = arith.constant 0 : index
    %c0_3 = arith.constant 0 : index
    %4 = vector.load %arg3[%c0_2, %c0_3] : memref<8x512xf32, #tpu.memory_space<vmem>>, vector<8x512xf32>
    %c0_4 = arith.constant 0 : index
    %c0_5 = arith.constant 0 : index
    %5 = vector.load %arg4[%c0_4, %c0_5] : memref<512x128xf32, #tpu.memory_space<vmem>>, vector<512x128xf32>
    %cst = arith.constant dense<0.000000e+00> : vector<8x128xf32>
    %6 = tpu.matmul %4, %5, %cst {dimension_numbers = #tpu.dot_dimension_numbers<[1], [0], [0], [1], [0, 0, 1, 1], [], []>} : vector<8x512xf32>, vector<512x128xf32>, vector<8x128xf32> -> vector<8x128xf32>
    %7 = arith.addf %3, %6 : vector<8x128xf32>
    %c0_6 = arith.constant 0 : index
    %c0_7 = arith.constant 0 : index
    %8 = vector.load %arg7[%c0_6, %c0_7] : memref<8x128xf32, #tpu.memory_space<vmem>>, vector<8x128xf32>
    tpu.vector_store %arg7[%c0_6, %c0_7], %7 {strides = array<i32>} : memref<8x128xf32, #tpu.memory_space<vmem>>, vector<8x128xf32>,
    %c1_i32 = arith.constant 1 : i32
    %9 = arith.cmpi eq, %arg2, %c1_i32 : i32
    %10 = arith.extui %9 : i1 to i32
    %c0_i32_8 = arith.constant 0 : i32
    %11 = arith.cmpi ne, %10, %c0_i32_8 : i32
    scf.if %11 {
      %c0_9 = arith.constant 0 : index
      %c0_10 = arith.constant 0 : index
      %12 = vector.load %arg7[%c0_9, %c0_10] : memref<8x128xf32, #tpu.memory_space<vmem>>, vector<8x128xf32>
      %c0_11 = arith.constant 0 : index
      %c0_12 = arith.constant 0 : index
      %13 = vector.load %arg5[%c0_11, %c0_12] : memref<1x128xf32, #tpu.memory_space<vmem>>, vector<1x128xf32>
      %14 = vector.broadcast %13 : vector<1x128xf32> to vector<8x128xf32>
      %15 = arith.addf %12, %14 : vector<8x128xf32>
      %c0_13 = arith.constant 0 : index
      %c0_14 = arith.constant 0 : index
      %16 = vector.load %arg6[%c0_13, %c0_14] : memref<8x128xf32, #tpu.memory_space<vmem>>, vector<8x128xf32>
      tpu.vector_store %arg6[%c0_13, %c0_14], %15 {strides = array<i32>} : memref<8x128xf32, #tpu.memory_space<vmem>>, vector<8x128xf32>,
    } else {
    }
    return
  }
  func.func @transform_0(%arg0: i32, %arg1: i32, %arg2: i32) -> (i32, i32) {
    %c0_i32 = arith.constant 0 : i32
    return %arg0, %arg2 : i32, i32
  }
  func.func @transform_1(%arg0: i32, %arg1: i32, %arg2: i32) -> (i32, i32) {
    %c0_i32 = arith.constant 0 : i32
    return %arg2, %arg1 : i32, i32
  }
  func.func @transform_2(%arg0: i32, %arg1: i32, %arg2: i32) -> (i32, i32) {
    %c0_i32 = arith.constant 0 : i32
    %c0_i32_0 = arith.constant 0 : i32
    return %c0_i32, %arg1 : i32, i32
  }
  func.func @transform_3(%arg0: i32, %arg1: i32, %arg2: i32) -> (i32, i32) {
    %c0_i32 = arith.constant 0 : i32
    return %arg0, %arg1 : i32, i32
  }
}

</mosaic_0001>

<bundles_post_ra>
// kernel: tpu_custom_call.1
= control target key start
LH: loop header
LB: loop body
LE: loop exit
PB: predicated region body
PF: predicated region fallthrough
CT: control target
= control target key end

     0   :  { %8 = vsyncpa [#allocation4], 0  ;;  %s1005_s0 = inlined_call_operand.hbm [shape: f32[8,1024], index: 0, kind: input, shape index: {}]   ;;  %s1006_s1 = inlined_call_operand.hbm [shape: f32[1024,128], index: 1, kind: input, shape index: {}]   ;;  %s1007_s2 = inlined_call_operand.vmem [shape: f32[1,128], index: 2, kind: input, shape index: {}]   ;;  %s1008_s3 = inlined_call_operand.hbm [shape: f32[8,128], index: 3, kind: output, shape index: {}]  }
   0x1   :  { %10 = vsyncpa [#allocation4 + $0x1], 0 }
   0x2   :  { %11 = vsyncpa [#allocation7], 0 }
   0x3   :  { %13 = vsyncpa [#allocation7 + $0x1], 0 }
   0x4   :  { %14 = vsyncpa [#allocation5], 0  ;;  %s816_s12 = smov 0   ;;  %s818_s13 = smov 0  }
   0x5   :  { %s820_s14 = smov 0   ;;  %s822_s15 = smov 0  }
   0x6   :  { %s824_s16 = smov 0   ;;  %s826_s17 = smov 0  }
   0x7 LB: > { %s552_s18 = sadd.s32 4294967295, %s790_s17   ;;  %s32_s19 = sadd.s32 1, %s786_s16  ;;  %s790_s17 = sphi %s826_s17, %s20_s17   ;;  %s786_s16 = sphi %s824_s16, %s1016_s16   ;;  %s782_s15 = sphi %s822_s15, %s1015_s15   ;;  %s778_s14 = sphi %s820_s14, %s1014_s14   ;;  %s774_s13 = sphi %s818_s13, %s1013_s13   ;;  %s770_s12 = sphi %s816_s12, %s1012_s12  }
   0x8   : > { %p33_p0 = scmp.ge.s32.totalorder %s32_s19, 2  ;;  %s48_s20 = sadd.s32 1, %s778_s14 }
   0x9   : > { %p55_p1 = scmp.ne.s32.totalorder %s778_s14, %s774_s13  ;;  %p56_p2 = scmp.eq.s32.totalorder %s790_s17, 0 }
   0xa   : > { %s1018_s19 = smov (%p33_p0, %s32_s19), 0  ;;  %p61_p4 = scmp.ne.s32.totalorder %s774_s13, %s770_s12 }
   0xb   : > { %p852_p3 = por %p56_p2, %p55_p1  ;;  %s44_s22 = ssub.s32 %s786_s16, %s1018_s19 }
   0xc   : > { %p62_p5 = scmp.eq.s32.totalorder %s552_s18, 0  ;;  %p46_p6 = scmp.eq.s32.totalorder %s44_s22, 0 }
   0xd   : > { %p588_p8 = scmp.lt.s32.totalorder %s790_s17, 2  ;;  %s870_s25 = sand.u32 1, %s778_s14  }
   0xe   : > { %p861_p7 = por %p62_p5, %p61_p4  ;;  %s571_s26 = sshll.u32 %s786_s16, 5 }
   0xf   : > { %s867_s24 = scalar_select %p46_p6, %s778_s14, %s48_s20  }
  0x10   : > { %s556_s27 = sshll.u32 %s870_s25, 5  ;;  %s184_s30 = scalar_lea.hbm %s1005_s0, %s571_s26 }
  0x11   : > { %s186_s4 = sshll.u32 %s184_s30, 4  ;;  %s177_s5 = scalar_lea.vmem [#allocation3], %s556_s27  ;;  %s187_s4 = int_to_ptr.hbm [resolvable:$true] %s186_s4 }
  0x12   : > { %s188_s6 = sshll.u32 %s177_s5, 4  ;;  %p879_p9 = pnand %p588_p8, %p852_p3  ;;  %s189_s6 = int_to_ptr.vmem [resolvable:$true] %s188_s6 }
  0x13   : > { %p562_p10 = scmp.ge.s32.totalorder %s790_s17, 1  ;;  %p216_p11 = scmp.lt.s32.totalorder %s790_s17, 3 }
  0x14   : > { %s559_s8 = sshll.u32 %s870_s25, 9  ;;  %s174_s9 = scalar_lea.sflag [#allocation4], %s870_s25 }
  0x15   : > { %584 = dma.hbm_to_vmem [thread:$0]  (!%p879_p9), %s187_s4, 512, %s189_s6, %s174_s9  }
  0x16   : > { %p217_p12 = pnand %p562_p10, %p216_p11  ;;  %s572_s10 = sshll.u32 %s786_s16, 9 }
  0x17   : > { %s199_s11 = scalar_lea.vmem [#allocation6], %s559_s8  ;;  %s205_s21 = scalar_lea.hbm %s1006_s1, %s572_s10 }
  0x18   : > { %s208_s12 = sshll.u32 %s199_s11, 4  ;;  %s206_s26 = sshll.u32 %s205_s21, 4  ;;  %s209_s12 = int_to_ptr.vmem [resolvable:$true] %s208_s12  ;;  %s207_s26 = int_to_ptr.hbm [resolvable:$true] %s206_s26 }
  0x19   : > { %s196_s27 = scalar_lea.sflag [#allocation7], %s870_s25  ;;  %s792_s28 = smov 128  }
  0x1a   : > { %s793_s29 = smov 8   ;;  %220 = sbr.rel (%p217_p12) target bundleno = 232 (0xe8), region = 32 }
  0x1b   : > { %587 = dma.hbm_to_vmem [thread:$0]  (!%p879_p9), %s207_s26, 8192, %s209_s12, %s196_s27, %s792_s28, %s792_s28, %s793_s29  }
  0x1c   : > { %s222_s30 = sand.u32 (!%p217_p12), 1, %s774_s13  }
  0x1d   : > { %s563_s4 = sshll.u32 (!%p217_p12), %s222_s30, 5  ;;  %s223_s5 = scalar_lea.sflag (!%p217_p12), [#allocation4], %s222_s30 }
  0x1e   : > { %s897_s6 = scalar_lea.vmem (!%p217_p12), [#allocation3], %s563_s4 }
  0x1f   : > { %757 = dma.done.wait (%p861_p7), %s223_s5, 512  }
  0x20   : > { %759 = vsyncadd (%p861_p7), %s223_s5, 4294966784  ;;  %s564_s8 = sshll.u32 %s222_s30, 9  ;;  %s233_s25 = scalar_lea.sflag [#allocation7], %s222_s30 }
  0x21   : > { %s903_s9 = scalar_lea.vmem [#allocation6], %s564_s8 }
  0x22   : > { %761 = dma.done.wait (%p861_p7), %s233_s25, 8192  }
  0x23   : > { %763 = vsyncadd (%p861_p7), %s233_s25, 4294959104  ;;  %p565_p13 = scmp.ne.s32.totalorder %s782_s15, 0 }
  0x25   : > { %271 = sbr.rel (%p565_p13) target bundleno = 44 (0x2c), region = 44 }
  0x2a   : > { %v794_v0 = vmov 0.0  }
  0x2b   : > { %272 = vst [vmem:[#allocation2] sm:$0xff] %v794_v0 }
  0x2c PF: > { %v325_v1 = vld [vmem:[%s903_s9 + $0x178] sm:$0xff]  ;;  %v324_v2 = vld [vmem:[%s903_s9 + $0x170] sm:$0xff]  ;;  %v323_v6 = vld [vmem:[%s903_s9 + $0x168] sm:$0xff]  ;;  %p566_p0 = scmp.ne.s32.totalorder %s782_s15, 1 }
  0x2d   : > { %v341_v3 = vld [vmem:[%s903_s9 + $0x1f8] sm:$0xff]  ;;  %382 = vmatpush.msra.mxu2 %v325_v1  ;;  %v340_v7 = vld [vmem:[%s903_s9 + $0x1f0] sm:$0xff]  ;;  %v339_v10 = vld [vmem:[%s903_s9 + $0x1e8] sm:$0xff] }
  0x2e   : > { %402 = vmatpush.msra.mxu3 %v341_v3  ;;  %v293_v4 = vld [vmem:[%s903_s9 + $0x78] sm:$0xff]  ;;  %v292_v8 = vld [vmem:[%s903_s9 + $0x70] sm:$0xff]  ;;  %v291_v11 = vld [vmem:[%s903_s9 + $0x68] sm:$0xff] }
  0x2f   : > { %v309_v5 = vld [vmem:[%s903_s9 + $0xf8] sm:$0xff]  ;;  %342 = vmatpush.msra.mxu0 %v293_v4  ;;  %v308_v9 = vld [vmem:[%s903_s9 + $0xf0] sm:$0xff]  ;;  %383 = vmatpush.msra.mxu2 %v324_v2  ;;  %v322_v12 = vld [vmem:[%s903_s9 + $0x160] sm:$0xff] }
  0x30   : > { %362 = vmatpush.msra.mxu1 %v309_v5  ;;  %403 = vmatpush.msra.mxu3 %v340_v7  ;;  %v307_v13 = vld [vmem:[%s903_s9 + $0xe8] sm:$0xff]  ;;  %v338_v14 = vld [vmem:[%s903_s9 + $0x1e0] sm:$0xff]  ;;  %v321_v17 = vld [vmem:[%s903_s9 + $0x158] sm:$0xff] }
  0x31   : > { %343 = vmatpush.msra.mxu0 %v292_v8  ;;  %384 = vmatpush.msra.mxu2 %v323_v6  ;;  %v290_v15 = vld [vmem:[%s903_s9 + $0x60] sm:$0xff]  ;;  %v337_v18 = vld [vmem:[%s903_s9 + $0x1d8] sm:$0xff]  ;;  %v320_v21 = vld [vmem:[%s903_s9 + $0x150] sm:$0xff] }
  0x32   : > { %363 = vmatpush.msra.mxu1 %v308_v9  ;;  %404 = vmatpush.msra.mxu3 %v339_v10  ;;  %v306_v16 = vld [vmem:[%s903_s9 + $0xe0] sm:$0xff]  ;;  %v289_v19 = vld [vmem:[%s903_s9 + $0x58] sm:$0xff]  ;;  %v336_v22 = vld [vmem:[%s903_s9 + $0x1d0] sm:$0xff] }
  0x33   : > { %344 = vmatpush.msra.mxu0 %v291_v11  ;;  %385 = vmatpush.msra.mxu2 %v322_v12  ;;  %v305_v20 = vld [vmem:[%s903_s9 + $0xd8] sm:$0xff]  ;;  %v288_v23 = vld [vmem:[%s903_s9 + $0x50] sm:$0xff]  ;;  %v319_v25 = vld [vmem:[%s903_s9 + $0x148] sm:$0xff] }
  0x34   : > { %364 = vmatpush.msra.mxu1 %v307_v13  ;;  %405 = vmatpush.msra.mxu3 %v338_v14  ;;  %v304_v24 = vld [vmem:[%s903_s9 + $0xd0] sm:$0xff]  ;;  %v335_v26 = vld [vmem:[%s903_s9 + $0x1c8] sm:$0xff]  ;;  %v318_v29 = vld [vmem:[%s903_s9 + $0x140] sm:$0xff] }
  0x35   : > { %345 = vmatpush.msra.mxu0 %v290_v15  ;;  %386 = vmatpush.msra.mxu2 %v321_v17  ;;  %v287_v27 = vld [vmem:[%s903_s9 + $0x48] sm:$0xff]  ;;  %v334_v30 = vld [vmem:[%s903_s9 + $0x1c0] sm:$0xff]  ;;  %v317_v33 = vld [vmem:[%s903_s9 + $0x138] sm:$0xff] }
  0x36   : > { %365 = vmatpush.msra.mxu1 %v306_v16  ;;  %406 = vmatpush.msra.mxu3 %v337_v18  ;;  %v303_v28 = vld [vmem:[%s903_s9 + $0xc8] sm:$0xff]  ;;  %v286_v31 = vld [vmem:[%s903_s9 + $0x40] sm:$0xff]  ;;  %v333_v34 = vld [vmem:[%s903_s9 + $0x1b8] sm:$0xff] }
  0x37   : > { %346 = vmatpush.msra.mxu0 %v289_v19  ;;  %387 = vmatpush.msra.mxu2 %v320_v21  ;;  %v302_v32 = vld [vmem:[%s903_s9 + $0xc0] sm:$0xff]  ;;  %v285_v35 = vld [vmem:[%s903_s9 + $0x38] sm:$0xff]  ;;  %v316_v37 = vld [vmem:[%s903_s9 + $0x130] sm:$0xff] }
  0x38   : > { %366 = vmatpush.msra.mxu1 %v305_v20  ;;  %407 = vmatpush.msra.mxu3 %v336_v22  ;;  %v301_v36 = vld [vmem:[%s903_s9 + $0xb8] sm:$0xff]  ;;  %v332_v38 = vld [vmem:[%s903_s9 + $0x1b0] sm:$0xff]  ;;  %v315_v41 = vld [vmem:[%s903_s9 + $0x128] sm:$0xff] }
  0x39   : > { %347 = vmatpush.msra.mxu0 %v288_v23  ;;  %388 = vmatpush.msra.mxu2 %v319_v25  ;;  %v284_v39 = vld [vmem:[%s903_s9 + $0x30] sm:$0xff]  ;;  %v331_v42 = vld [vmem:[%s903_s9 + $0x1a8] sm:$0xff]  ;;  %v314_v45 = vld [vmem:[%s903_s9 + $0x120] sm:$0xff] }
  0x3a   : > { %367 = vmatpush.msra.mxu1 %v304_v24  ;;  %408 = vmatpush.msra.mxu3 %v335_v26  ;;  %v300_v40 = vld [vmem:[%s903_s9 + $0xb0] sm:$0xff]  ;;  %v283_v43 = vld [vmem:[%s903_s9 + $0x28] sm:$0xff]  ;;  %v330_v46 = vld [vmem:[%s903_s9 + $0x1a0] sm:$0xff] }
  0x3b   : > { %348 = vmatpush.msra.mxu0 %v287_v27  ;;  %389 = vmatpush.msra.mxu2 %v318_v29  ;;  %v299_v44 = vld [vmem:[%s903_s9 + $0xa8] sm:$0xff]  ;;  %v282_v47 = vld [vmem:[%s903_s9 + $0x20] sm:$0xff]  ;;  %v313_v49 = vld [vmem:[%s903_s9 + $0x118] sm:$0xff] }
  0x3c   : > { %368 = vmatpush.msra.mxu1 %v303_v28  ;;  %409 = vmatpush.msra.mxu3 %v334_v30  ;;  %v298_v48 = vld [vmem:[%s903_s9 + $0xa0] sm:$0xff]  ;;  %v329_v50 = vld [vmem:[%s903_s9 + $0x198] sm:$0xff]  ;;  %v312_v53 = vld [vmem:[%s903_s9 + $0x110] sm:$0xff] }
  0x3d   : > { %349 = vmatpush.msra.mxu0 %v286_v31  ;;  %390 = vmatpush.msra.mxu2 %v317_v33  ;;  %v281_v51 = vld [vmem:[%s903_s9 + $0x18] sm:$0xff]  ;;  %v328_v54 = vld [vmem:[%s903_s9 + $0x190] sm:$0xff]  ;;  %v311_v57 = vld [vmem:[%s903_s9 + $0x108] sm:$0xff] }
  0x3e   : > { %369 = vmatpush.msra.mxu1 %v302_v32  ;;  %410 = vmatpush.msra.mxu3 %v333_v34  ;;  %v297_v52 = vld [vmem:[%s903_s9 + $0x98] sm:$0xff]  ;;  %v280_v55 = vld [vmem:[%s903_s9 + $0x10] sm:$0xff]  ;;  %v327_v58 = vld [vmem:[%s903_s9 + $0x188] sm:$0xff] }
  0x3f   : > { %350 = vmatpush.msra.mxu0 %v285_v35  ;;  %391 = vmatpush.msra.mxu2 %v316_v37  ;;  %v296_v56 = vld [vmem:[%s903_s9 + $0x90] sm:$0xff]  ;;  %v279_v59 = vld [vmem:[%s903_s9 + $0x8] sm:$0xff]  ;;  %v310_v61 = vld [vmem:[%s903_s9 + $0x100] sm:$0xff] }
  0x40   : > { %370 = vmatpush.msra.mxu1 %v301_v36  ;;  %411 = vmatpush.msra.mxu3 %v332_v38  ;;  %v295_v60 = vld [vmem:[%s903_s9 + $0x88] sm:$0xff]  ;;  %v326_v62 = vld [vmem:[%s903_s9 + $0x180] sm:$0xff]  ;;  %v276_v63 = vld [vmem:[%s897_s6 + $0x10] sm:$0xff] }
  0x41   : > { %351 = vmatpush.msra.mxu0 %v284_v39  ;;  %392 = vmatpush.msra.mxu2 %v315_v41  ;;  %v277_v0 = vld [vmem:[%s897_s6 + $0x18] sm:$0xff]  ;;  %v278_v1 = vld [vmem:[%s903_s9] sm:$0xff]  ;;  %v275_v4 = vld [vmem:[%s897_s6 + $0x8] sm:$0xff] }
  0x42   : > { %371 = vmatpush.msra.mxu1 %v300_v40  ;;  %412 = vmatpush.msra.mxu3 %v331_v42  ;;  %v294_v2 = vld [vmem:[%s903_s9 + $0x80] sm:$0xff]  ;;  %v273_v11 = vld [vmem:[#allocation2] sm:$0xff] }
  0x43   : > { %352 = vmatpush.msra.mxu0 %v283_v43  ;;  %393 = vmatpush.msra.mxu2 %v314_v45  ;;  %v274_v3 = vld [vmem:[%s897_s6] sm:$0xff] }
  0x44   : > { %372 = vmatpush.msra.mxu1 %v299_v44  ;;  %413 = vmatpush.msra.mxu3 %v330_v46 }
  0x45   : > { %353 = vmatpush.msra.mxu0 %v282_v47  ;;  %394 = vmatpush.msra.mxu2 %v313_v49 }
  0x46   : > { %373 = vmatpush.msra.mxu1 %v298_v48  ;;  %414 = vmatpush.msra.mxu3 %v329_v50 }
  0x47   : > { %354 = vmatpush.msra.mxu0 %v281_v51  ;;  %395 = vmatpush.msra.mxu2 %v312_v53 }
  0x48   : > { %374 = vmatpush.msra.mxu1 %v297_v52  ;;  %415 = vmatpush.msra.mxu3 %v328_v54 }
  0x49   : > { %355 = vmatpush.msra.mxu0 %v280_v55  ;;  %396 = vmatpush.msra.mxu2 %v311_v57 }
  0x4a   : > { %375 = vmatpush.msra.mxu1 %v296_v56  ;;  %416 = vmatpush.msra.mxu3 %v327_v58 }
  0x4b   : > { %356 = vmatpush.msra.mxu0 %v279_v59  ;;  %397 = vmatpush.msra.mxu2 %v310_v61 }
  0x4c   : > { %376 = vmatpush.msra.mxu1 %v295_v60  ;;  %417 = vmatpush.msra.mxu3 %v326_v62 }
  0x4d   : > { %398 = vmatmul.f32.vlgmr.msra.gmra.mxu2 %v276_v63  ;;  %418 = vmatmul.f32.vlgmr.msra.gmra.mxu3 %v277_v0 }
  0x4e   : > { %357 = vmatpush.msra.mxu0 %v278_v1  ;;  %377 = vmatpush.msra.mxu1 %v294_v2 }
  0x4f   : > { %358 = vmatmul.f32.vlgmr.msra.gmra.mxu0 %v274_v3  ;;  %378 = vmatmul.f32.vlgmr.msra.gmra.mxu1 %v275_v4 }
  0xcc   : > { %v359_v5 = vpop.f32.mrf.mxu0  ;;  %v379_v6 = vpop.f32.mrf.mxu1 }
  0xcd   : > { %v380_v7 = vadd.f32 %v379_v6, %v359_v5 }
  0xd0   : > { %v399_v8 = vpop.f32.mrf.mxu2  ;;  %v419_v9 = vpop.f32.mrf.mxu3 }
  0xd1   : > { %v400_v10 = vadd.f32 %v399_v8, %v380_v7 }
  0xd3   : > { %v420_v12 = vadd.f32 %v419_v9, %v400_v10  ;;  %427 = sbr.rel (%p566_p0) target bundleno = 226 (0xe2), region = 48 }
  0xd5   : > { %v422_v13 = vadd.f32 %v420_v12, %v273_v11 }
  0xd7   : > { %423 = vst [vmem:[#allocation2] sm:$0xff] %v422_v13 }
  0xd8   : > { %v643_v15 = vld [vmem:[%s1007_s2] ss:$0 sm:$0xff] }
  0xde   : > { %v428_v14 = vld [vmem:[#allocation2] sm:$0xff] }
  0xdf   : > { %v433_v16 = vadd.f32 %v643_v15, %v428_v14 }
  0xe1   : > { %434 = vst [vmem:[#allocation8] sm:$0xff] %v433_v16 }
  0xe2 PF: > { %p589_p1 = scmp.eq.s32.totalorder %s552_s18, 1  ;;  %s446_s12 = sshll.u32 %s1008_s3, 4  ;;  %s447_s12 = int_to_ptr.hbm [resolvable:$true] %s446_s12 }
  0xe3   : > { %s795_s20 = smov [#allocation8]  }
  0xe4   : > { %s444_s22 = sshll.u32 %s795_s20, 4  ;;  %s445_s22 = int_to_ptr.vmem [resolvable:$true] %s444_s22 }
  0xe5   : > { %578 = dma.vmem_to_hbm [thread:$0]  (%p589_p1), %s445_s22, 128, %s447_s12, [#allocation5]  }
  0xe6   : > { %765 = dma.done.wait (%p589_p1), [#allocation5], 128  }
  0xe7   : > { %767 = vsyncadd (%p589_p1), [#allocation5], 4294967168 }
  0xe8 PF: > { %s20_s17 = sadd.s32 1, %s790_s17   ;;  %s1012_s12 = smov %s774_s13 }
  0xe9   : > { %p17_p2 = scmp.ge.s32.totalorder %s20_s17, 4   ;;  %s1013_s13 = smov %s778_s14 }
  0xea   : > { %s1014_s14 = smov %s867_s24  ;;  %s1015_s15 = smov %s786_s16 }
  0xeb   : > { %s1016_s16 = smov %s1018_s19  ;;  %19 = sbr.rel (!%p17_p2) target bundleno = 7 (0x7), region = 94 }
  0xf0   :  { %460 = vsyncpa [#allocation4], 1 }
  0xf1   :  { %462 = vsyncpa [#allocation4 + $0x1], 1 }
  0xf2   :  { %463 = vsyncpa [#allocation7], 1 }
  0xf3   :  { %465 = vsyncpa [#allocation7 + $0x1], 1 }
  0xf4   :  { %466 = vsyncpa [#allocation5], 1 }
  0xf5   :  { %468 = vsyncpa [#allocation5 + $0x1], 1 }

</bundles_post_ra>
